<compile_context>
chip_gen: v6e
topology: v6e:2x2x1
jax: 0.10.0
libtpu: 0.0.40
codegen_flags: <defaults>
</compile_context>

<pallas_src>
import functools

import jax
import jax.numpy as jnp
from jax.experimental import pallas as pl
from jax.experimental.pallas import tpu as pltpu

_LANES = 128
_MAX_TM = 1024  # rows per grid step (1024*128*4 B = 512 KiB per input block)


def _l1mse_kernel(x_ref, y_ref, o_ref, acc_sq_ref, acc_ab_ref, *,
                  n_elements, n_rows, alpha, mask_rows):
    i = pl.program_id(0)
    tm = x_ref.shape[0]

    @pl.when(i == 0)
    def _():
        acc_sq_ref[...] = jnp.zeros_like(acc_sq_ref)
        acc_ab_ref[...] = jnp.zeros_like(acc_ab_ref)

    d = x_ref[...].astype(jnp.float32) - y_ref[...].astype(jnp.float32)

    if mask_rows:
        # Final grid block may extend past the real row count; kill the
        # out-of-bounds (unspecified-content) rows.  Cheap VPU work, hidden
        # under the DMA of the next block.
        row_ids = jax.lax.broadcasted_iota(jnp.int32, d.shape, 0) + i * tm
        d = jnp.where(row_ids < n_rows, d, 0.0)

    # Pure elementwise accumulation (VPU only); 128*tm parallel partial sums
    # also improves f32 accumulation accuracy vs. a single running scalar.
    acc_sq_ref[...] += d * d
    acc_ab_ref[...] += jnp.abs(d)

    @pl.when(i == pl.num_programs(0) - 1)
    def _():
        sum_sq = jnp.sum(acc_sq_ref[...])
        sum_ab = jnp.sum(acc_ab_ref[...])
        o_ref[0, 0] = (jnp.float32(alpha) * sum_sq
                       + jnp.float32(1.0 - alpha) * sum_ab) / jnp.float32(n_elements)


def l1_mse_loss(x, y, alpha=0.5):
    assert x.shape == y.shape, "L1MSELoss here assumes matching shapes (no broadcasting)"
    n_elements = x.size

    xf = jnp.ravel(x)
    yf = jnp.ravel(y)

    # Only pad to a lane multiple (max 127 elements) when strictly needed for
    # the (rows, 128) view; zero-padding both operands contributes 0 to both
    # sums.  This is a no-op for lane-aligned inputs (e.g. 2*4*16*16 = 2048).
    pad = (-n_elements) % _LANES
    if pad:
        xf = jnp.pad(xf, (0, pad))
        yf = jnp.pad(yf, (0, pad))

    rows = xf.size // _LANES
    x2d = xf.reshape(rows, _LANES)
    y2d = yf.reshape(rows, _LANES)

    if rows <= _MAX_TM:
        tm = rows          # single full-extent block, grid of 1
    else:
        tm = _MAX_TM       # multiple of 8, satisfies the (8,128) constraint
    num_steps = pl.cdiv(rows, tm)
    mask_rows = (num_steps * tm) > rows  # only mask if a ragged edge block exists

    kernel = functools.partial(
        _l1mse_kernel,
        n_elements=n_elements,
        n_rows=rows,
        alpha=float(alpha),
        mask_rows=mask_rows,
    )

    out = pl.pallas_call(
        kernel,
        out_shape=jax.ShapeDtypeStruct((1, 1), jnp.float32),
        grid_spec=pltpu.PrefetchScalarGridSpec(
            num_scalar_prefetch=0,
            grid=(num_steps,),
            in_specs=[
                pl.BlockSpec((tm, _LANES), lambda i: (i, 0)),
                pl.BlockSpec((tm, _LANES), lambda i: (i, 0)),
            ],
            out_specs=pl.BlockSpec(memory_space=pltpu.SMEM),
            scratch_shapes=[
                pltpu.VMEM((tm, _LANES), jnp.float32),  # sum of squared diffs
                pltpu.VMEM((tm, _LANES), jnp.float32),  # sum of abs diffs
            ],
        ),
        compiler_params=pltpu.CompilerParams(
            # Sequential carried accumulator -> the (single) grid axis must be
            # "arbitrary".
            dimension_semantics=("arbitrary",),
        ),
    )(x2d, y2d)

    return out[0, 0]


if __name__ == "__main__":
    key = jax.random.PRNGKey(0)
    kx, ky = jax.random.split(key)
    x = jax.random.normal(kx, (2, 4, 16, 16), dtype=jnp.float32)
    y = jax.random.normal(ky, (2, 4, 16, 16), dtype=jnp.float32)

    alpha = 0.5
    loss = l1_mse_loss(x, y, alpha=alpha)
    jax.block_until_ready(loss)

    # Sanity check against plain-JAX reference of the PyTorch module.
    ref = alpha * jnp.mean((x - y) ** 2) + (1.0 - alpha) * jnp.mean(jnp.abs(x - y))
    assert jnp.allclose(loss, ref, rtol=1e-6, atol=1e-6), (loss, ref)

    print("KERNEL_OK")
</pallas_src>

<mosaic_0001>
module attributes {stable_mosaic.version = 11 : i64} {
  func.func @_l1mse_kernel(%arg0: i32, %arg1: memref<16x128xf32, #tpu.memory_space<vmem>>, %arg2: memref<16x128xf32, #tpu.memory_space<vmem>>, %arg3: memref<1x1xf32, #tpu.memory_space<smem>>, %arg4: memref<16x128xf32, #tpu.memory_space<vmem>>, %arg5: memref<16x128xf32, #tpu.memory_space<vmem>>) attributes {dimension_semantics = [#tpu.dimension_semantics<arbitrary>], iteration_bounds = array<i64: 1>, scalar_prefetch = 0 : i64, scratch_operands = 2 : i64, tpu.core_type = #tpu.core_type<tc>, window_params = [{transform_indices = @transform_0, window_bounds = array<i64: 16, 128>}, {transform_indices = @transform_1, window_bounds = array<i64: 16, 128>}, {transform_indices = @transform_2, window_bounds = array<i64: 1, 1>}]} {
    %c0_i32 = arith.constant 0 : i32
    %0 = arith.cmpi eq, %arg0, %c0_i32 : i32
    %1 = arith.extui %0 : i1 to i32
    %c0_i32_0 = arith.constant 0 : i32
    %2 = arith.cmpi ne, %1, %c0_i32_0 : i32
    scf.if %2 {
      %cst = arith.constant 0.000000e+00 : f32
      %17 = vector.broadcast %cst : f32 to vector<16x128xf32>
      %c0_14 = arith.constant 0 : index
      %c0_15 = arith.constant 0 : index
      %18 = vector.load %arg4[%c0_14, %c0_15] : memref<16x128xf32, #tpu.memory_space<vmem>>, vector<16x128xf32>
      tpu.vector_store %arg4[%c0_14, %c0_15], %17 {strides = array<i32>} : memref<16x128xf32, #tpu.memory_space<vmem>>, vector<16x128xf32>,
      %cst_16 = arith.constant 0.000000e+00 : f32
      %19 = vector.broadcast %cst_16 : f32 to vector<16x128xf32>
      %c0_17 = arith.constant 0 : index
      %c0_18 = arith.constant 0 : index
      %20 = vector.load %arg5[%c0_17, %c0_18] : memref<16x128xf32, #tpu.memory_space<vmem>>, vector<16x128xf32>
      tpu.vector_store %arg5[%c0_17, %c0_18], %19 {strides = array<i32>} : memref<16x128xf32, #tpu.memory_space<vmem>>, vector<16x128xf32>,
    } else {
    }
    %c0 = arith.constant 0 : index
    %c0_1 = arith.constant 0 : index
    %3 = vector.load %arg1[%c0, %c0_1] : memref<16x128xf32, #tpu.memory_space<vmem>>, vector<16x128xf32>
    %c0_2 = arith.constant 0 : index
    %c0_3 = arith.constant 0 : index
    %4 = vector.load %arg2[%c0_2, %c0_3] : memref<16x128xf32, #tpu.memory_space<vmem>>, vector<16x128xf32>
    %5 = arith.subf %3, %4 : vector<16x128xf32>
    %c0_4 = arith.constant 0 : index
    %c0_5 = arith.constant 0 : index
    %6 = vector.load %arg4[%c0_4, %c0_5] : memref<16x128xf32, #tpu.memory_space<vmem>>, vector<16x128xf32>
    %7 = arith.mulf %5, %5 : vector<16x128xf32>
    %8 = arith.addf %6, %7 : vector<16x128xf32>
    %c0_6 = arith.constant 0 : index
    %c0_7 = arith.constant 0 : index
    %9 = vector.load %arg4[%c0_6, %c0_7] : memref<16x128xf32, #tpu.memory_space<vmem>>, vector<16x128xf32>
    tpu.vector_store %arg4[%c0_6, %c0_7], %8 {strides = array<i32>} : memref<16x128xf32, #tpu.memory_space<vmem>>, vector<16x128xf32>,
    %c0_8 = arith.constant 0 : index
    %c0_9 = arith.constant 0 : index
    %10 = vector.load %arg5[%c0_8, %c0_9] : memref<16x128xf32, #tpu.memory_space<vmem>>, vector<16x128xf32>
    %11 = math.absf %5 : vector<16x128xf32>
    %12 = arith.addf %10, %11 : vector<16x128xf32>
    %c0_10 = arith.constant 0 : index
    %c0_11 = arith.constant 0 : index
    %13 = vector.load %arg5[%c0_10, %c0_11] : memref<16x128xf32, #tpu.memory_space<vmem>>, vector<16x128xf32>
    tpu.vector_store %arg5[%c0_10, %c0_11], %12 {strides = array<i32>} : memref<16x128xf32, #tpu.memory_space<vmem>>, vector<16x128xf32>,
    %c0_i32_12 = arith.constant 0 : i32
    %14 = arith.cmpi eq, %arg0, %c0_i32_12 : i32
    %15 = arith.extui %14 : i1 to i32
    %c0_i32_13 = arith.constant 0 : i32
    %16 = arith.cmpi ne, %15, %c0_i32_13 : i32
    scf.if %16 {
      %c0_14 = arith.constant 0 : index
      %c0_15 = arith.constant 0 : index
      %17 = vector.load %arg4[%c0_14, %c0_15] : memref<16x128xf32, #tpu.memory_space<vmem>>, vector<16x128xf32>
      %18 = vector.shape_cast %17 : vector<16x128xf32> to vector<1x16x128xf32>
      %cst = arith.constant dense<0.000000e+00> : vector<1xf32>
      %19 = vector.multi_reduction <add>, %18, %cst [1, 2] : vector<1x16x128xf32> to vector<1xf32>
      %20 = vector.shape_cast %19 : vector<1xf32> to vector<1x1x1xf32>
      %21 = vector.extract %20[0, 0, 0] : f32 from vector<1x1x1xf32>
      %c0_16 = arith.constant 0 : index
      %c0_17 = arith.constant 0 : index
      %22 = vector.load %arg5[%c0_16, %c0_17] : memref<16x128xf32, #tpu.memory_space<vmem>>, vector<16x128xf32>
      %23 = vector.shape_cast %22 : vector<16x128xf32> to vector<1x16x128xf32>
      %cst_18 = arith.constant dense<0.000000e+00> : vector<1xf32>
      %24 = vector.multi_reduction <add>, %23, %cst_18 [1, 2] : vector<1x16x128xf32> to vector<1xf32>
      %25 = vector.shape_cast %24 : vector<1xf32> to vector<1x1x1xf32>
      %26 = vector.extract %25[0, 0, 0] : f32 from vector<1x1x1xf32>
      %cst_19 = arith.constant 5.000000e-01 : f32
      %27 = arith.mulf %cst_19, %21 : f32
      %cst_20 = arith.constant 5.000000e-01 : f32
      %28 = arith.mulf %cst_20, %26 : f32
      %29 = arith.addf %27, %28 : f32
      %cst_21 = arith.constant 2.048000e+03 : f32
      %30 = arith.divf %29, %cst_21 : f32
      %c0_22 = arith.constant 0 : index
      %c0_23 = arith.constant 0 : index
      %31 = memref.load %arg3[%c0_22, %c0_23] : memref<1x1xf32, #tpu.memory_space<smem>>
      memref.store %30, %arg3[%c0_22, %c0_23] : memref<1x1xf32, #tpu.memory_space<smem>>
    } else {
    }
    return
  }
  func.func @transform_0(%arg0: i32) -> (i32, i32) {
    %c0_i32 = arith.constant 0 : i32
    %c0_i32_0 = arith.constant 0 : i32
    return %arg0, %c0_i32 : i32, i32
  }
  func.func @transform_1(%arg0: i32) -> (i32, i32) {
    %c0_i32 = arith.constant 0 : i32
    %c0_i32_0 = arith.constant 0 : i32
    return %arg0, %c0_i32 : i32, i32
  }
  func.func @transform_2(%arg0: i32) -> (i32, i32) {
    %c0_i32 = arith.constant 0 : i32
    %c0_i32_0 = arith.constant 0 : i32
    %c0_i32_1 = arith.constant 0 : i32
    return %c0_i32, %c0_i32_0 : i32, i32
  }
}

</mosaic_0001>

<bundles_post_ra>
// kernel: tpu_custom_call.1
= control target key start
LH: loop header
LB: loop body
LE: loop exit
PB: predicated region body
PF: predicated region fallthrough
CT: control target
= control target key end

     0   :  { %7 = vsyncpa [#allocation5], 0  ;;  %s212_s0 = inlined_call_operand.hbm [shape: f32[16,128], index: 0, kind: input, shape index: {}]   ;;  %s213_s1 = inlined_call_operand.hbm [shape: f32[16,128], index: 1, kind: input, shape index: {}]   ;;  %s214_s2 = inlined_call_operand.hbm [shape: f32[1,1], index: 2, kind: output, shape index: {}]  }
   0x1   :  { %8 = vsyncpa [#allocation8], 0 }
   0x2   :  { %9 = vsyncpa [#allocation6], 0  ;;  %s183_s9 = smov [#allocation4]  }
   0x3   :  { %s15_s10 = sshll.u32 %s183_s9, 4  ;;  %s16_s10 = int_to_ptr.vmem [resolvable:$true] %s15_s10 }
   0x4   :  { %s137_s11 = scalar_lea.vmem %s16_s10, 256  ;;  %p142_p1 = scmp.lt.s32.totalorder %s16_s10, %s16_s10 }
   0x5   :  { %p138_p0 = scmp.ne.s32.totalorder %s16_s10, %s137_s11  ;;  %p143_p2 = scmp.lt.s32.totalorder %s137_s11, %s137_s11 }
   0x7   :  { %p144_p3 = por %p143_p2, %p142_p1 }
   0x9   :  { %p145_p4 = pnand %p144_p3, %p138_p0 }
   0xb   :  { %148 = shalt.err (!%p145_p4)
}
   0xc   :  { %s184_s12 = smov 128   ;;  %s185_s13 = smov 8  }
   0xd   :  { %21 = dma.hbm_to_vmem [thread:$0]  %s212_s0, 256, %s16_s10, [#allocation5], %s184_s12, %s184_s12, %s185_s13  }
   0xe   :  { %s186_s16 = smov [#allocation7]  }
   0xf   :  { %s27_s17 = sshll.u32 %s186_s16, 4  ;;  %s28_s17 = int_to_ptr.vmem [resolvable:$true] %s27_s17 }
  0x10   :  { %s157_s18 = scalar_lea.vmem %s28_s17, 256  ;;  %p162_p6 = scmp.lt.s32.totalorder %s28_s17, %s28_s17 }
  0x11   :  { %p158_p5 = scmp.ne.s32.totalorder %s28_s17, %s157_s18  ;;  %p163_p7 = scmp.lt.s32.totalorder %s157_s18, %s157_s18 }
  0x13   :  { %p164_p8 = por %p163_p7, %p162_p6 }
  0x15   :  { %p165_p9 = pnand %p164_p8, %p158_p5 }
  0x17   :  { %168 = shalt.err (!%p165_p9)
}
  0x18   :  { %33 = dma.hbm_to_vmem [thread:$0]  %s213_s1, 256, %s28_s17, [#allocation8], %s184_s12, %s184_s12, %s185_s13  }
  0x19   :  { %177 = dma.done.wait [#allocation5], 256  }
  0x1a   :  { %178 = vsyncadd [#allocation5], 4294967040 }
  0x1b   :  { %179 = dma.done.wait [#allocation8], 256  }
  0x1c   :  { %180 = vsyncadd [#allocation8], 4294967040  ;;  %v48_v0 = vld [vmem:[#allocation4] sm:$0xff]  ;;  %v49_v1 = vld [vmem:[#allocation4 + $0x8] sm:$0xff]  ;;  %s187_s25 = smov [#allocation9]  }
  0x1d   :  { %v50_v2 = vld [vmem:[#allocation7] sm:$0xff]  ;;  %v51_v3 = vld [vmem:[#allocation7 + $0x8] sm:$0xff] }
  0x1e   :  { %v52_v4 = vsub.f32 %v48_v0, %v50_v2  ;;  %v53_v5 = vsub.f32 %v49_v1, %v51_v3 }
  0x20   :  { %v56_v6 = vmul.f32 %v52_v4, %v52_v4  ;;  %v57_v7 = vmul.f32 %v53_v5, %v53_v5  ;;  %v64_v8 = vand.u32 2147483647, %v52_v4  ;;  %v65_v9 = vand.u32 2147483647, %v53_v5 }
  0x22   :  { %v75_v10 = vadd.f32 %v57_v7, %v56_v6  ;;  %v87_v11 = vadd.f32 %v65_v9, %v64_v8 }
  0x24   :  { %76 = vadd.xlane.f32.xlu0 %v75_v10 }
  0x28   :  { %88 = vadd.xlane.f32.xlu0 %v87_v11 }
  0xad   :  { %v77_v12 = vpop.xlane.xlu0 %76 }
  0xae   :  { %v78_v13 = vrot.slane %v77_v12, 4 }
  0xb0   :  { %v79_v14 = vadd.f32 %v78_v13, %v77_v12 }
  0xb1   :  { %v89_v15 = vpop.xlane.xlu0 %88 }
  0xb2   :  { %v80_v16 = vrot.slane %v79_v14, 2  ;;  %v90_v17 = vrot.slane %v89_v15, 4 }
  0xb4   :  { %v91_v18 = vadd.f32 %v90_v17, %v89_v15  ;;  %v81_v19 = vadd.f32 %v80_v16, %v79_v14 }
  0xb6   :  { %v92_v20 = vrot.slane %v91_v18, 2  ;;  %v82_v21 = vrot.slane %v81_v19, 1 }
  0xb8   :  { %v93_v22 = vadd.f32 %v92_v20, %v91_v18  ;;  %v83_v23 = vadd.f32 %v82_v21, %v81_v19 }
  0xba   :  { %120 = vpush %v83_v23  ;;  %v94_v24 = vrot.slane %v93_v22, 1 }
  0xbc   :  { %v95_v25 = vadd.f32 %v94_v24, %v93_v22 }
  0xbe   :  { %122 = vpush %v95_v25 }
  0xeb   :  { %s121_s0 = spop %120 }
  0xec   :  { %s97_s1 = smul.f32 0.5, %s121_s0 }
  0xef   :  { %s123_s21 = spop %122 }
  0xf0   :  { %s98_s22 = smul.f32 0.5, %s123_s21 }
  0xf2   :  { %s99_s23 = sadd.f32 %s98_s22, %s97_s1 }
  0xf4   :  { %s102_s24 = smul.f32 0.00048828125, %s99_s23 }
  0xf6   :  { %104 = sst [smem:[#allocation9]] %s102_s24 }
  0xf7   :  { %112 = dma.smem_to_hbm %s187_s25, 16, %s214_s2, [#allocation6]  }
  0xf8   :  { %181 = dma.done.wait [#allocation6], 16  }
  0xf9   :  { %182 = vsyncadd [#allocation6], 4294967280 }
  0xfa   :  { %116 = sfence }
  0xfb   :  { %117 = vsyncpa [#allocation5], 1 }
  0xfc   :  { %118 = vsyncpa [#allocation8], 1 }
  0xfd   :  { %119 = vsyncpa [#allocation6], 1 }

</bundles_post_ra>
